<compile_context>
chip_gen: v7x
topology: tpu7x:2x2x1
jax: 0.10.0
libtpu: 0.0.40
codegen_flags: <defaults>
</compile_context>

<pallas_src>
import math
from functools import partial

import jax
import jax.numpy as jnp
from jax import lax
from jax.experimental import pallas as pl
from jax.experimental.pallas import tpu as pltpu

EPS = 1e-8
NEG_INF = -1.0e9


def _rmsnorm(x, alpha, eps=EPS):
    # alpha * (x / (sqrt(mean(x^2, -1)) + eps)); eps added AFTER sqrt, as in the reference.
    d = x.shape[-1]
    mean = jnp.sum(x * x, axis=-1, keepdims=True) * (1.0 / d)
    inv = pl.reciprocal(jnp.sqrt(mean) + eps, approx=True)
    return alpha * (x * inv)


def _decoder_block_kernel(x_ref,
                          alpha1_ref, wq_ref, wk_ref, wv_ref, wo_ref,
                          alpha3_ref, w1_ref, b1_ref, w2_ref, b2_ref,
                          out_ref, *, heads, head_dim):
    S, D = x_ref.shape
    x = x_ref[...]                                           # (S, D) f32 residual stream

    # ---- pre-norm + QKV projections (bf16 operands, f32 accumulation) ----
    xn = _rmsnorm(x, alpha1_ref[...]).astype(jnp.bfloat16)
    q = jnp.dot(xn, wq_ref[...], preferred_element_type=jnp.float32)    # (S, D)
    k = jnp.dot(xn, wk_ref[...], preferred_element_type=jnp.float32)
    v = jnp.dot(xn, wv_ref[...], preferred_element_type=jnp.float32)

    # ---- heads-batched scaled dot-product attention, layout (H, S, hd) ----
    qh = q.reshape(S, heads, head_dim).swapaxes(0, 1).astype(jnp.bfloat16)
    kh = k.reshape(S, heads, head_dim).swapaxes(0, 1).astype(jnp.bfloat16)
    vh = v.reshape(S, heads, head_dim).swapaxes(0, 1).astype(jnp.bfloat16)

    scale = 1.0 / math.sqrt(head_dim)
    s = jnp.einsum('hqd,hkd->hqk', qh, kh,
                   preferred_element_type=jnp.float32) * scale          # (H, S, S) f32

    # causal target mask generated in-kernel: keep where query_idx >= key_idx (== tril mask)
    row = lax.broadcasted_iota(jnp.int32, (1, S, S), 1)
    col = lax.broadcasted_iota(jnp.int32, (1, S, S), 2)
    s = jnp.where(row >= col, s, NEG_INF)

    s = s - jnp.max(s, axis=-1, keepdims=True)
    p = jnp.exp(s)
    p = p * pl.reciprocal(jnp.sum(p, axis=-1, keepdims=True), approx=True)
    # attention dropout(p=0.1) is identity in eval mode

    ctx = jnp.einsum('hqk,hkd->hqd', p.astype(jnp.bfloat16), vh,
                     preferred_element_type=jnp.float32)                # (H, S, hd)
    attn = ctx.swapaxes(0, 1).reshape(S, D).astype(jnp.bfloat16)        # (S, H*hd)
    attn = jnp.dot(attn, wo_ref[...], preferred_element_type=jnp.float32)

    x = x + attn                                             # residual 1 (dropout1 = identity)

    # ---- pre-norm + SiLU feed-forward ----
    xn3 = _rmsnorm(x, alpha3_ref[...]).astype(jnp.bfloat16)
    h1 = jnp.dot(xn3, w1_ref[...], preferred_element_type=jnp.float32) + b1_ref[...]
    h1 = h1 * jax.nn.sigmoid(h1)                             # SiLU, f32 elementwise
    ff = jnp.dot(h1.astype(jnp.bfloat16), w2_ref[...],
                 preferred_element_type=jnp.float32) + b2_ref[...]

    out_ref[...] = x + ff                                    # residual 2 (dropout3 = identity)


def _final_norm_kernel(x_ref, alpha_ref, out_ref):
    out_ref[...] = _rmsnorm(x_ref[...], alpha_ref[...])


def _const_spec(shape):
    # Block == full array; index_map constant across the grid (no re-DMA across grid steps).
    return pl.BlockSpec(shape, lambda b: (0,) * len(shape))


def _vmem_limit_bytes(S, D, d_ff, heads):
    w = 2 * (4 * D * D + 2 * D * d_ff) * 2                   # bf16 weights, double-buffered
    act = 2 * 2 * S * D * 4                                  # f32 x in/out, double-buffered
    scratch = (heads * S * S + 2 * S * d_ff + 10 * S * D) * 4  # scores / ffn hidden / temps
    est = 2 * (w + act + scratch)                            # 2x slack
    return int(min(max(est, 32 * 1024 * 1024), 64 * 1024 * 1024))


def decoder_block(x, p, *, heads):
    B, S, D = x.shape
    d_ff = p["w1_t"].shape[1]
    kernel = partial(_decoder_block_kernel, heads=heads, head_dim=D // heads)
    return pl.pallas_call(
        kernel,
        out_shape=jax.ShapeDtypeStruct((B, S, D), x.dtype),
        grid=(B,),
        in_specs=[
            pl.BlockSpec((None, S, D), lambda b: (b, 0, 0)),   # x (per-batch slab)
            _const_spec((1, D)),                               # alpha1 (f32)
            _const_spec((D, D)),                               # Wq^T (bf16)
            _const_spec((D, D)),                               # Wk^T (bf16)
            _const_spec((D, D)),                               # Wv^T (bf16)
            _const_spec((D, D)),                               # Wo^T (bf16)
            _const_spec((1, D)),                               # alpha3 (f32)
            _const_spec((D, d_ff)),                            # W1^T (bf16)
            _const_spec((1, d_ff)),                            # b1 (f32)
            _const_spec((d_ff, D)),                            # W2^T (bf16)
            _const_spec((1, D)),                               # b2 (f32)
        ],
        out_specs=pl.BlockSpec((None, S, D), lambda b: (b, 0, 0)),
        compiler_params=pltpu.CompilerParams(
            dimension_semantics=("parallel",),
            vmem_limit_bytes=_vmem_limit_bytes(S, D, d_ff, heads)),
    )(x, p["alpha1"], p["wq_t"], p["wk_t"], p["wv_t"], p["wo_t"],
      p["alpha3"], p["w1_t"], p["b1"], p["w2_t"], p["b2"])


def final_norm(x, alpha):
    B, S, D = x.shape
    return pl.pallas_call(
        _final_norm_kernel,
        out_shape=jax.ShapeDtypeStruct((B, S, D), x.dtype),
        grid=(B,),
        in_specs=[
            pl.BlockSpec((None, S, D), lambda b: (b, 0, 0)),
            _const_spec((1, D)),
        ],
        out_specs=pl.BlockSpec((None, S, D), lambda b: (b, 0, 0)),
        compiler_params=pltpu.CompilerParams(dimension_semantics=("parallel",)),
    )(x, alpha)


def decoder_forward(x, params, *, heads):
    # Causal (tril) target mask is generated inside the kernel; freqs_complex_form is unused
    # by the reference forward pass.
    for p in params["blocks"]:
        x = decoder_block(x, p, heads=heads)
    return final_norm(x, params["final_alpha"])


def init_params(key, number_of_block, d_model, d_ff):
    """Deterministic synthetic init. Linear weights pre-transposed (in, out), stored in bf16."""
    scale = 0.02
    blocks = []
    for i in range(number_of_block):
        ks = jax.random.split(jax.random.fold_in(key, i), 6)

        def w(k, shape):
            return (scale * jax.random.normal(k, shape, jnp.float32)).astype(jnp.bfloat16)

        blocks.append(dict(
            alpha1=jnp.ones((1, d_model), jnp.float32),          # RMSNorm1 gain
            alpha3=jnp.ones((1, d_model), jnp.float32),          # RMSNorm3 gain
            wq_t=w(ks[0], (d_model, d_model)),
            wk_t=w(ks[1], (d_model, d_model)),
            wv_t=w(ks[2], (d_model, d_model)),
            wo_t=w(ks[3], (d_model, d_model)),
            w1_t=w(ks[4], (d_model, d_ff)),
            b1=jnp.zeros((1, d_ff), jnp.float32),
            w2_t=w(ks[5], (d_ff, d_model)),
            b2=jnp.zeros((1, d_model), jnp.float32),
        ))
    return dict(blocks=blocks, final_alpha=jnp.ones((1, d_model), jnp.float32))


if __name__ == "__main__":
    B, S, D, H, D_FF, N_BLOCK = 2, 8, 32, 4, 64, 2

    key = jax.random.PRNGKey(0)
    kx, kp = jax.random.split(key)

    x = jax.random.normal(kx, (B, S, D), jnp.float32)
    params = init_params(kp, N_BLOCK, D, D_FF)

    y = decoder_forward(x, params, heads=H)
    jax.block_until_ready(y)
    assert y.shape == (B, S, D)
    assert bool(jnp.all(jnp.isfinite(y)))
    print("KERNEL_OK")
</pallas_src>

<mosaic_0001>
module attributes {stable_mosaic.version = 11 : i64} {
  func.func @_decoder_block_kernel(%arg0: i32, %arg1: memref<1x8x32xf32, #tpu.memory_space<vmem>>, %arg2: memref<1x32xf32, #tpu.memory_space<vmem>>, %arg3: memref<32x32xbf16, #tpu.memory_space<vmem>>, %arg4: memref<32x32xbf16, #tpu.memory_space<vmem>>, %arg5: memref<32x32xbf16, #tpu.memory_space<vmem>>, %arg6: memref<32x32xbf16, #tpu.memory_space<vmem>>, %arg7: memref<1x32xf32, #tpu.memory_space<vmem>>, %arg8: memref<32x64xbf16, #tpu.memory_space<vmem>>, %arg9: memref<1x64xf32, #tpu.memory_space<vmem>>, %arg10: memref<64x32xbf16, #tpu.memory_space<vmem>>, %arg11: memref<1x32xf32, #tpu.memory_space<vmem>>, %arg12: memref<1x8x32xf32, #tpu.memory_space<vmem>>) attributes {dimension_semantics = [#tpu.dimension_semantics<parallel>], iteration_bounds = array<i64: 2>, scalar_prefetch = 0 : i64, scratch_operands = 0 : i64, tpu.core_type = #tpu.core_type<tc>, window_params = [{transform_indices = @transform_0, window_bounds = array<i64: 1, 8, 32>}, {pipeline_mode = #tpu.pipeline_mode<synchronous>, transform_indices = @transform_1, window_bounds = array<i64: 1, 32>}, {pipeline_mode = #tpu.pipeline_mode<synchronous>, transform_indices = @transform_2, window_bounds = array<i64: 32, 32>}, {pipeline_mode = #tpu.pipeline_mode<synchronous>, transform_indices = @transform_3, window_bounds = array<i64: 32, 32>}, {pipeline_mode = #tpu.pipeline_mode<synchronous>, transform_indices = @transform_4, window_bounds = array<i64: 32, 32>}, {pipeline_mode = #tpu.pipeline_mode<synchronous>, transform_indices = @transform_5, window_bounds = array<i64: 32, 32>}, {pipeline_mode = #tpu.pipeline_mode<synchronous>, transform_indices = @transform_6, window_bounds = array<i64: 1, 32>}, {pipeline_mode = #tpu.pipeline_mode<synchronous>, transform_indices = @transform_7, window_bounds = array<i64: 32, 64>}, {pipeline_mode = #tpu.pipeline_mode<synchronous>, transform_indices = @transform_8, window_bounds = array<i64: 1, 64>}, {pipeline_mode = #tpu.pipeline_mode<synchronous>, transform_indices = @transform_9, window_bounds = array<i64: 64, 32>}, {pipeline_mode = #tpu.pipeline_mode<synchronous>, transform_indices = @transform_10, window_bounds = array<i64: 1, 32>}, {transform_indices = @transform_11, window_bounds = array<i64: 1, 8, 32>}]} {
    %c0 = arith.constant 0 : index
    %c0_0 = arith.constant 0 : index
    %c0_1 = arith.constant 0 : index
    %0 = vector.load %arg1[%c0, %c0_0, %c0_1] : memref<1x8x32xf32, #tpu.memory_space<vmem>>, vector<1x8x32xf32>
    %1 = vector.shape_cast %0 : vector<1x8x32xf32> to vector<8x32xf32>
    %c0_2 = arith.constant 0 : index
    %c0_3 = arith.constant 0 : index
    %2 = vector.load %arg2[%c0_2, %c0_3] : memref<1x32xf32, #tpu.memory_space<vmem>>, vector<1x32xf32>
    %3 = arith.mulf %1, %1 : vector<8x32xf32>
    %cst = arith.constant dense<0.000000e+00> : vector<8xf32>
    %4 = vector.multi_reduction <add>, %3, %cst [1] : vector<8x32xf32> to vector<8xf32>
    %5 = vector.shape_cast %4 : vector<8xf32> to vector<8x1xf32>
    %cst_4 = arith.constant 3.125000e-02 : f32
    %6 = vector.broadcast %cst_4 : f32 to vector<8x1xf32>
    %7 = arith.mulf %5, %6 : vector<8x1xf32>
    %8 = math.sqrt %7 : vector<8x1xf32>
    %cst_5 = arith.constant 9.99999993E-9 : f32
    %9 = vector.broadcast %cst_5 : f32 to vector<8x1xf32>
    %10 = arith.addf %8, %9 : vector<8x1xf32>
    %11 = tpu.reciprocal %10 {approx = true} : vector<8x1xf32> -> vector<8x1xf32>
    %12 = vector.broadcast %11 : vector<8x1xf32> to vector<8x32xf32>
    %13 = arith.mulf %1, %12 : vector<8x32xf32>
    %14 = vector.broadcast %2 : vector<1x32xf32> to vector<8x32xf32>
    %15 = arith.mulf %14, %13 : vector<8x32xf32>
    %16 = arith.truncf %15 : vector<8x32xf32> to vector<8x32xbf16>
    %c0_6 = arith.constant 0 : index
    %c0_7 = arith.constant 0 : index
    %17 = vector.load %arg3[%c0_6, %c0_7] : memref<32x32xbf16, #tpu.memory_space<vmem>>, vector<32x32xbf16>
    %cst_8 = arith.constant dense<0.000000e+00> : vector<8x32xf32>
    %18 = tpu.matmul %16, %17, %cst_8 {dimension_numbers = #tpu.dot_dimension_numbers<[1], [0], [0], [1], [0, 0, 1, 1], [], []>} : vector<8x32xbf16>, vector<32x32xbf16>, vector<8x32xf32> -> vector<8x32xf32>
    %c0_9 = arith.constant 0 : index
    %c0_10 = arith.constant 0 : index
    %19 = vector.load %arg4[%c0_9, %c0_10] : memref<32x32xbf16, #tpu.memory_space<vmem>>, vector<32x32xbf16>
    %cst_11 = arith.constant dense<0.000000e+00> : vector<8x32xf32>
    %20 = tpu.matmul %16, %19, %cst_11 {dimension_numbers = #tpu.dot_dimension_numbers<[1], [0], [0], [1], [0, 0, 1, 1], [], []>} : vector<8x32xbf16>, vector<32x32xbf16>, vector<8x32xf32> -> vector<8x32xf32>
    %c0_12 = arith.constant 0 : index
    %c0_13 = arith.constant 0 : index
    %21 = vector.load %arg5[%c0_12, %c0_13] : memref<32x32xbf16, #tpu.memory_space<vmem>>, vector<32x32xbf16>
    %cst_14 = arith.constant dense<0.000000e+00> : vector<8x32xf32>
    %22 = tpu.matmul %16, %21, %cst_14 {dimension_numbers = #tpu.dot_dimension_numbers<[1], [0], [0], [1], [0, 0, 1, 1], [], []>} : vector<8x32xbf16>, vector<32x32xbf16>, vector<8x32xf32> -> vector<8x32xf32>
    %23 = vector.shape_cast %18 : vector<8x32xf32> to vector<8x4x8xf32>
    %24 = tpu.transpose %23, [1, 0, 2] : vector<8x4x8xf32> -> vector<4x8x8xf32>
    %25 = arith.truncf %24 : vector<4x8x8xf32> to vector<4x8x8xbf16>
    %26 = vector.shape_cast %20 : vector<8x32xf32> to vector<8x4x8xf32>
    %27 = tpu.transpose %26, [1, 0, 2] : vector<8x4x8xf32> -> vector<4x8x8xf32>
    %28 = arith.truncf %27 : vector<4x8x8xf32> to vector<4x8x8xbf16>
    %29 = vector.shape_cast %22 : vector<8x32xf32> to vector<8x4x8xf32>
    %30 = tpu.transpose %29, [1, 0, 2] : vector<8x4x8xf32> -> vector<4x8x8xf32>
    %31 = arith.truncf %30 : vector<4x8x8xf32> to vector<4x8x8xbf16>
    "tpu.trace_start"() <{level = 10 : i32, message = "hqd,hkd->hqk"}> : () -> ()
    %cst_15 = arith.constant dense<0.000000e+00> : vector<4x8x8xf32>
    %32 = tpu.matmul %25, %28, %cst_15 {dimension_numbers = #tpu.dot_dimension_numbers<[2], [2], [1], [1], [0, 0, 0, 1, 1, 1], [0], [0]>} : vector<4x8x8xbf16>, vector<4x8x8xbf16>, vector<4x8x8xf32> -> vector<4x8x8xf32>
    "tpu.trace_stop"() : () -> ()
    %cst_16 = arith.constant 0.353553385 : f32
    %33 = vector.broadcast %cst_16 : f32 to vector<4x8x8xf32>
    %34 = arith.mulf %32, %33 : vector<4x8x8xf32>
    %35 = tpu.iota {dimensions = array<i32: 1>} : vector<1x8x8xi32>
    %36 = tpu.iota {dimensions = array<i32: 2>} : vector<1x8x8xi32>
    %37 = arith.cmpi sge, %35, %36 : vector<1x8x8xi32>
    %cst_17 = arith.constant -1.000000e+09 : f32
    %38 = vector.shape_cast %37 : vector<1x8x8xi1> to vector<1x8x8xi1>
    %39 = vector.broadcast %38 : vector<1x8x8xi1> to vector<4x8x8xi1>
    %40 = vector.broadcast %cst_17 : f32 to vector<4x8x8xf32>
    %41 = arith.select %39, %34, %40 : vector<4x8x8xi1>, vector<4x8x8xf32>
    %cst_18 = arith.constant dense<0xFF800000> : vector<4x8xf32>
    %42 = vector.multi_reduction <maximumf>, %41, %cst_18 [2] : vector<4x8x8xf32> to vector<4x8xf32>
    %43 = vector.shape_cast %42 : vector<4x8xf32> to vector<4x8x1xf32>
    %44 = vector.broadcast %43 : vector<4x8x1xf32> to vector<4x8x8xf32>
    %45 = arith.subf %41, %44 : vector<4x8x8xf32>
    %46 = math.exp %45 : vector<4x8x8xf32>
    %cst_19 = arith.constant dense<0.000000e+00> : vector<4x8xf32>
    %47 = vector.multi_reduction <add>, %46, %cst_19 [2] : vector<4x8x8xf32> to vector<4x8xf32>
    %48 = vector.shape_cast %47 : vector<4x8xf32> to vector<4x8x1xf32>
    %49 = tpu.reciprocal %48 {approx = true} : vector<4x8x1xf32> -> vector<4x8x1xf32>
    %50 = vector.broadcast %49 : vector<4x8x1xf32> to vector<4x8x8xf32>
    %51 = arith.mulf %46, %50 : vector<4x8x8xf32>
    %52 = arith.truncf %51 : vector<4x8x8xf32> to vector<4x8x8xbf16>
    "tpu.trace_start"() <{level = 10 : i32, message = "hqk,hkd->hqd"}> : () -> ()
    %cst_20 = arith.constant dense<0.000000e+00> : vector<4x8x8xf32>
    %53 = tpu.matmul %52, %31, %cst_20 {dimension_numbers = #tpu.dot_dimension_numbers<[2], [1], [1], [2], [0, 0, 0, 1, 1, 2], [0], [0]>} : vector<4x8x8xbf16>, vector<4x8x8xbf16>, vector<4x8x8xf32> -> vector<4x8x8xf32>
    "tpu.trace_stop"() : () -> ()
    %54 = tpu.transpose %53, [1, 0, 2] : vector<4x8x8xf32> -> vector<8x4x8xf32>
    %55 = vector.shape_cast %54 : vector<8x4x8xf32> to vector<8x32xf32>
    %56 = arith.truncf %55 : vector<8x32xf32> to vector<8x32xbf16>
    %c0_21 = arith.constant 0 : index
    %c0_22 = arith.constant 0 : index
    %57 = vector.load %arg6[%c0_21, %c0_22] : memref<32x32xbf16, #tpu.memory_space<vmem>>, vector<32x32xbf16>
    %cst_23 = arith.constant dense<0.000000e+00> : vector<8x32xf32>
    %58 = tpu.matmul %56, %57, %cst_23 {dimension_numbers = #tpu.dot_dimension_numbers<[1], [0], [0], [1], [0, 0, 1, 1], [], []>} : vector<8x32xbf16>, vector<32x32xbf16>, vector<8x32xf32> -> vector<8x32xf32>
    %59 = arith.addf %1, %58 : vector<8x32xf32>
    %c0_24 = arith.constant 0 : index
    %c0_25 = arith.constant 0 : index
    %60 = vector.load %arg7[%c0_24, %c0_25] : memref<1x32xf32, #tpu.memory_space<vmem>>, vector<1x32xf32>
    %61 = arith.mulf %59, %59 : vector<8x32xf32>
    %cst_26 = arith.constant dense<0.000000e+00> : vector<8xf32>
    %62 = vector.multi_reduction <add>, %61, %cst_26 [1] : vector<8x32xf32> to vector<8xf32>
    %63 = vector.shape_cast %62 : vector<8xf32> to vector<8x1xf32>
    %cst_27 = arith.constant 3.125000e-02 : f32
    %64 = vector.broadcast %cst_27 : f32 to vector<8x1xf32>
    %65 = arith.mulf %63, %64 : vector<8x1xf32>
    %66 = math.sqrt %65 : vector<8x1xf32>
    %cst_28 = arith.constant 9.99999993E-9 : f32
    %67 = vector.broadcast %cst_28 : f32 to vector<8x1xf32>
    %68 = arith.addf %66, %67 : vector<8x1xf32>
    %69 = tpu.reciprocal %68 {approx = true} : vector<8x1xf32> -> vector<8x1xf32>
    %70 = vector.broadcast %69 : vector<8x1xf32> to vector<8x32xf32>
    %71 = arith.mulf %59, %70 : vector<8x32xf32>
    %72 = vector.broadcast %60 : vector<1x32xf32> to vector<8x32xf32>
    %73 = arith.mulf %72, %71 : vector<8x32xf32>
    %74 = arith.truncf %73 : vector<8x32xf32> to vector<8x32xbf16>
    %c0_29 = arith.constant 0 : index
    %c0_30 = arith.constant 0 : index
    %75 = vector.load %arg8[%c0_29, %c0_30] : memref<32x64xbf16, #tpu.memory_space<vmem>>, vector<32x64xbf16>
    %cst_31 = arith.constant dense<0.000000e+00> : vector<8x64xf32>
    %76 = tpu.matmul %74, %75, %cst_31 {dimension_numbers = #tpu.dot_dimension_numbers<[1], [0], [0], [1], [0, 0, 1, 1], [], []>} : vector<8x32xbf16>, vector<32x64xbf16>, vector<8x64xf32> -> vector<8x64xf32>
    %c0_32 = arith.constant 0 : index
    %c0_33 = arith.constant 0 : index
    %77 = vector.load %arg9[%c0_32, %c0_33] : memref<1x64xf32, #tpu.memory_space<vmem>>, vector<1x64xf32>
    %78 = vector.broadcast %77 : vector<1x64xf32> to vector<8x64xf32>
    %79 = arith.addf %76, %78 : vector<8x64xf32>
    %80 = arith.negf %79 : vector<8x64xf32>
    %81 = math.exp %80 : vector<8x64xf32>
    %cst_34 = arith.constant 1.000000e+00 : f32
    %82 = vector.broadcast %cst_34 : f32 to vector<8x64xf32>
    %83 = arith.addf %82, %81 : vector<8x64xf32>
    %84 = arith.divf %82, %83 : vector<8x64xf32>
    %85 = arith.mulf %79, %84 : vector<8x64xf32>
    %86 = arith.truncf %85 : vector<8x64xf32> to vector<8x64xbf16>
    %c0_35 = arith.constant 0 : index
    %c0_36 = arith.constant 0 : index
    %87 = vector.load %arg10[%c0_35, %c0_36] : memref<64x32xbf16, #tpu.memory_space<vmem>>, vector<64x32xbf16>
    %cst_37 = arith.constant dense<0.000000e+00> : vector<8x32xf32>
    %88 = tpu.matmul %86, %87, %cst_37 {dimension_numbers = #tpu.dot_dimension_numbers<[1], [0], [0], [1], [0, 0, 1, 1], [], []>} : vector<8x64xbf16>, vector<64x32xbf16>, vector<8x32xf32> -> vector<8x32xf32>
    %c0_38 = arith.constant 0 : index
    %c0_39 = arith.constant 0 : index
    %89 = vector.load %arg11[%c0_38, %c0_39] : memref<1x32xf32, #tpu.memory_space<vmem>>, vector<1x32xf32>
    %90 = vector.broadcast %89 : vector<1x32xf32> to vector<8x32xf32>
    %91 = arith.addf %88, %90 : vector<8x32xf32>
    %92 = arith.addf %59, %91 : vector<8x32xf32>
    %c0_40 = arith.constant 0 : index
    %c0_41 = arith.constant 0 : index
    %c0_42 = arith.constant 0 : index
    %93 = vector.load %arg12[%c0_40, %c0_41, %c0_42] : memref<1x8x32xf32, #tpu.memory_space<vmem>>, vector<1x8x32xf32>
    %94 = vector.shape_cast %93 : vector<1x8x32xf32> to vector<8x32xf32>
    %95 = vector.shape_cast %92 : vector<8x32xf32> to vector<1x8x32xf32>
    tpu.vector_store %arg12[%c0_40, %c0_41, %c0_42], %95 {strides = array<i32>} : memref<1x8x32xf32, #tpu.memory_space<vmem>>, vector<1x8x32xf32>,
    return
  }
  func.func @transform_0(%arg0: i32) -> (i32, i32, i32) {
    %c0_i32 = arith.constant 0 : i32
    %c0_i32_0 = arith.constant 0 : i32
    %c0_i32_1 = arith.constant 0 : i32
    return %arg0, %c0_i32, %c0_i32_0 : i32, i32, i32
  }
  func.func @transform_1(%arg0: i32) -> (i32, i32) {
    %c0_i32 = arith.constant 0 : i32
    %c0_i32_0 = arith.constant 0 : i32
    %c0_i32_1 = arith.constant 0 : i32
    return %c0_i32, %c0_i32_0 : i32, i32
  }
  func.func @transform_2(%arg0: i32) -> (i32, i32) {
    %c0_i32 = arith.constant 0 : i32
    %c0_i32_0 = arith.constant 0 : i32
    %c0_i32_1 = arith.constant 0 : i32
    return %c0_i32, %c0_i32_0 : i32, i32
  }
  func.func @transform_3(%arg0: i32) -> (i32, i32) {
    %c0_i32 = arith.constant 0 : i32
    %c0_i32_0 = arith.constant 0 : i32
    %c0_i32_1 = arith.constant 0 : i32
    return %c0_i32, %c0_i32_0 : i32, i32
  }
  func.func @transform_4(%arg0: i32) -> (i32, i32) {
    %c0_i32 = arith.constant 0 : i32
    %c0_i32_0 = arith.constant 0 : i32
    %c0_i32_1 = arith.constant 0 : i32
    return %c0_i32, %c0_i32_0 : i32, i32
  }
  func.func @transform_5(%arg0: i32) -> (i32, i32) {
    %c0_i32 = arith.constant 0 : i32
    %c0_i32_0 = arith.constant 0 : i32
    %c0_i32_1 = arith.constant 0 : i32
    return %c0_i32, %c0_i32_0 : i32, i32
  }
  func.func @transform_6(%arg0: i32) -> (i32, i32) {
    %c0_i32 = arith.constant 0 : i32
    %c0_i32_0 = arith.constant 0 : i32
    %c0_i32_1 = arith.constant 0 : i32
    return %c0_i32, %c0_i32_0 : i32, i32
  }
  func.func @transform_7(%arg0: i32) -> (i32, i32) {
    %c0_i32 = arith.constant 0 : i32
    %c0_i32_0 = arith.constant 0 : i32
    %c0_i32_1 = arith.constant 0 : i32
    return %c0_i32, %c0_i32_0 : i32, i32
  }
  func.func @transform_8(%arg0: i32) -> (i32, i32) {
    %c0_i32 = arith.constant 0 : i32
    %c0_i32_0 = arith.constant 0 : i32
    %c0_i32_1 = arith.constant 0 : i32
    return %c0_i32, %c0_i32_0 : i32, i32
  }
  func.func @transform_9(%arg0: i32) -> (i32, i32) {
    %c0_i32 = arith.constant 0 : i32
    %c0_i32_0 = arith.constant 0 : i32
    %c0_i32_1 = arith.constant 0 : i32
    return %c0_i32, %c0_i32_0 : i32, i32
  }
  func.func @transform_10(%arg0: i32) -> (i32, i32) {
    %c0_i32 = arith.constant 0 : i32
    %c0_i32_0 = arith.constant 0 : i32
    %c0_i32_1 = arith.constant 0 : i32
    return %c0_i32, %c0_i32_0 : i32, i32
  }
  func.func @transform_11(%arg0: i32) -> (i32, i32, i32) {
    %c0_i32 = arith.constant 0 : i32
    %c0_i32_0 = arith.constant 0 : i32
    %c0_i32_1 = arith.constant 0 : i32
    return %arg0, %c0_i32, %c0_i32_0 : i32, i32, i32
  }
}

</mosaic_0001>

<bundles_post_ra>
// kernel: tpu_custom_call.1
= control target key start
LH: loop header
LB: loop body
LE: loop exit
PB: predicated region body
PF: predicated region fallthrough
CT: control target
= control target key end

     0   :  { %s3019_s0 = inlined_call_operand.vmem [shape: f32[2,8,32], index: 0, kind: input, shape index: {}]   ;;  %s3020_s1 = inlined_call_operand.vmem [shape: f32[1,32], index: 1, kind: input, shape index: {}]   ;;  %s3021_s2 = inlined_call_operand.vmem [shape: bf16[32,32], index: 2, kind: input, shape index: {}]   ;;  %s3022_s3 = inlined_call_operand.vmem [shape: bf16[32,32], index: 3, kind: input, shape index: {}]   ;;  %s3023_s4 = inlined_call_operand.hbm [shape: bf16[32,32], index: 4, kind: input, shape index: {}]   ;;  %s3024_s5 = inlined_call_operand.hbm [shape: bf16[32,32], index: 5, kind: input, shape index: {}]   ;;  %s3025_s6 = inlined_call_operand.vmem [shape: f32[1,32], index: 6, kind: input, shape index: {}]   ;;  %s3026_s7 = inlined_call_operand.hbm [shape: bf16[32,64], index: 7, kind: input, shape index: {}]   ;;  %s3027_s8 = inlined_call_operand.vmem [shape: f32[1,64], index: 8, kind: input, shape index: {}]   ;;  %s3028_s9 = inlined_call_operand.vmem [shape: bf16[64,32], index: 9, kind: input, shape index: {}]   ;;  %s3029_s10 = inlined_call_operand.vmem [shape: f32[1,32], index: 10, kind: input, shape index: {}]   ;;  %s3030_s11 = inlined_call_operand.hbm [shape: f32[2,8,32], index: 11, kind: output, shape index: {}]  }
   0x1   :  { %3041 = sst [smem:[#allocation18_spill]] %s3030_s11 }
   0x2   :  { %16 = vsyncpa [#allocation3], 0 }
   0x3   :  { %17 = vsyncpa [#allocation6], 0 }
   0x4   :  { %18 = vsyncpa [#allocation4], 0 }
   0x5   :  { %20 = vsyncpa [#allocation4 + $0x1], 0  ;;  %s2557_s17 = smov 0   ;;  %s2559_s18 = smov 0  }
   0x6   :  { %s2561_s19 = smov 0   ;;  %s2563_s20 = smov 0  }
   0x7 LB: > { %3042 = sst [smem:[#allocation12_spill]] %s2467_s17  ;;  %s2578_s21 = sadd.s32 4294967295, %s2479_s20   ;;  %s2479_s20 = sphi %s2563_s20, %s3064_s20   ;;  %s2475_s19 = sphi %s2561_s19, %s3066_s19   ;;  %s2471_s18 = sphi %s2559_s18, %s3068_s18   ;;  %s2467_s17 = sphi %s2557_s17, %s3067_s17  }
   0x8   : > { %3043 = sst [smem:[#allocation13_spill]] %s2475_s19  ;;  %s2008_s22 = sadd.s32 4294967294, %s2479_s20  }
   0x9   : > { %3044 = sst [smem:[#allocation14_spill]] %s2479_s20  ;;  %s2582_s23 = sadd.s32 1, %s2479_s20  }
   0xa   : > { %3045 = sst [smem:[#allocation15_spill]] %s2582_s23  ;;  %s269_s24 = sadd.s32 1, %s2475_s19 }
   0xb   : > { %s266_s25 = ssub.s32 %s2479_s20, %s2582_s23  ;;  %p279_p0 = scmp.ne.s32.totalorder %s2475_s19, %s2471_s18 }
   0xc   : > { %p267_p1 = scmp.eq.s32.totalorder %s266_s25, 0  ;;  %p280_p2 = scmp.eq.s32.totalorder %s2578_s21, 1 }
   0xd   : > { %p285_p3 = scmp.ne.s32.totalorder %s2471_s18, %s2467_s17  ;;  %p286_p4 = scmp.eq.s32.totalorder %s2008_s22, 1 }
   0xe   : > { %s2593_s26 = scalar_select %p267_p1, %s2475_s19, %s269_s24  }
   0xf   : > { %p2595_p5 = por %p280_p2, %p279_p0  ;;  %p2599_p6 = por %p286_p4, %p285_p3 }
  0x10   : > { %3046 = sst [smem:[#allocation16_spill]] %s2593_s26  ;;  %p2009_p7 = scmp.ge.s32.totalorder %s2479_s20, 1 }
  0x11   : > { %s3047_s27 = scalar_select %p2595_p5, 1, 0 }
  0x12   : > { %s3048_s28 = scalar_select %p2599_p6, 1, 0 }
  0x13   : > { %p293_p8 = scmp.lt.s32.totalorder %s2479_s20, 3  ;;  %p3034_p9 = scmp.eq.s32.totalorder %s2578_s21, 0 }
  0x14   : > { %3049 = sst [smem:[#allocation17_spill]] %s3048_s28  ;;  %s2481_s30 = smov [#allocation5]  }
  0x15   : > { %p2606_p10 = pnand %p2009_p7, %p293_p8  ;;  %s327_s12 = sshll.u32 %s2481_s30, 4  ;;  %s2612_s12 = int_to_ptr.vmem [resolvable:$true] %s327_s12 }
  0x16   : > { %s2482_s14 = smov [#allocation2]   ;;  %s2483_s16 = smov [#allocation7]  }
  0x17   : > { %s3050_s29 = scalar_select %p2606_p10, 1, 0 }
  0x18   : > { %p2215_p11 = pneg %p2606_p10  ;;  %s314_s15 = sshll.u32 %s2482_s14, 4  ;;  %s2620_s15 = int_to_ptr.vmem [resolvable:$true] %s314_s15 }
  0x19   : > { %s2622_s22 = sshll.u32 %s2483_s16, 4  ;;  %s2325_s26 = scalar_lea.hbm %s3024_s5, 256  ;;  %s344_s22 = int_to_ptr.vmem [resolvable:$true] %s2622_s22 }
  0x1a   : > { %p2616_p12 = pnand %p3034_p9, %p2215_p11  ;;  %p2326_p13 = scmp.ne.s32.totalorder %s3024_s5, %s2325_s26 }
  0x1b   : > { %p2332_p3 = scmp.lt.u32.totalorder %s2325_s26, %s3024_s5 }
  0x1c   : > { %p2632_p0 = pneg %p2616_p12 }
  0x1e   : > { %p2328_p1 = pnand %p2632_p0, %p2326_p13 }
  0x20   : > { %p2329_p2 = pneg %p2328_p1 }
  0x22   : > { %p2334_p4 = pnand %p2332_p3, %p2329_p2 }
  0x24   : > { %2337 = shalt.err (!%p2334_p4)
}
  0x25   : > { %s2338_s19 = scalar_lea.vmem %s2612_s12, 256  ;;  %p2346_p9 = scmp.lt.s32.totalorder %s2612_s12, %s2612_s12 }
  0x26   : > { %p2339_p7 = scmp.ne.s32.totalorder %s2612_s12, %s2338_s19  ;;  %p2347_p6 = scmp.lt.s32.totalorder %s2338_s19, %s2338_s19 }
  0x28   : > { %p2341_p8 = pnand %p2339_p7, %p2632_p0  ;;  %p2348_p13 = por %p2347_p6, %p2346_p9 }
  0x2a   : > { %p2342_p11 = pneg %p2341_p8 }
  0x2c   : > { %p2349_p1 = pnand %p2348_p13, %p2342_p11 }
  0x2e   : > { %2352 = shalt.err (!%p2349_p1)
}
  0x2f   : > { %s2484_s24 = smov 64   ;;  %s2485_s26 = smov 4  }
  0x30   : > { %2221 = dma.hbm_to_vmem [thread:$0]  (!%p2616_p12), %s3024_s5, 256, %s2612_s12, [#allocation6], %s2484_s24, %s2484_s24, %s2485_s26  }
  0x31   : > { %s2353_s19 = scalar_lea.hbm %s3023_s4, 256 }
  0x32   : > { %p2354_p6 = scmp.ne.s32.totalorder %s3023_s4, %s2353_s19  ;;  %p2360_p3 = scmp.lt.u32.totalorder %s2353_s19, %s3023_s4 }
  0x34   : > { %p2356_p9 = pnand %p2354_p6, %p2632_p0 }
  0x36   : > { %p2357_p2 = pneg %p2356_p9 }
  0x38   : > { %p2362_p4 = pnand %p2360_p3, %p2357_p2 }
  0x3a   : > { %2365 = shalt.err (!%p2362_p4)
}
  0x3b   : > { %s2366_s12 = scalar_lea.vmem %s2620_s15, 256  ;;  %p2374_p13 = scmp.lt.s32.totalorder %s2620_s15, %s2620_s15 }
  0x3c   : > { %p2367_p7 = scmp.ne.s32.totalorder %s2620_s15, %s2366_s12  ;;  %p2375_p1 = scmp.lt.s32.totalorder %s2366_s12, %s2366_s12 }
  0x3e   : > { %p2369_p8 = pnand %p2367_p7, %p2632_p0  ;;  %p2376_p6 = por %p2375_p1, %p2374_p13 }
  0x40   : > { %p2370_p11 = pneg %p2369_p8 }
  0x42   : > { %p2377_p9 = pnand %p2376_p6, %p2370_p11 }
  0x44   : > { %2380 = shalt.err (!%p2377_p9)
}
  0x45   : > { %2218 = dma.hbm_to_vmem [thread:$0]  (!%p2616_p12), %s3023_s4, 256, %s2620_s15, [#allocation3], %s2484_s24, %s2484_s24, %s2485_s26  }
  0x46   : > { %s2381_s25 = scalar_lea.hbm %s3026_s7, 256 }
  0x47   : > { %p2382_p2 = scmp.ne.s32.totalorder %s3026_s7, %s2381_s25  ;;  %p2388_p7 = scmp.lt.u32.totalorder %s2381_s25, %s3026_s7 }
  0x49   : > { %p2384_p3 = pnand %p2382_p2, %p2632_p0 }
  0x4b   : > { %p2385_p4 = pneg %p2384_p3 }
  0x4d   : > { %p2390_p8 = pnand %p2388_p7, %p2385_p4 }
  0x4f   : > { %2393 = shalt.err (!%p2390_p8)
}
  0x50   : > { %s2394_s12 = scalar_lea.vmem %s344_s22, 256  ;;  %p2402_p6 = scmp.lt.s32.totalorder %s344_s22, %s344_s22 }
  0x51   : > { %p2395_p11 = scmp.ne.s32.totalorder %s344_s22, %s2394_s12  ;;  %p2403_p9 = scmp.lt.s32.totalorder %s2394_s12, %s2394_s12 }
  0x53   : > { %p2397_p13 = pnand %p2395_p11, %p2632_p0  ;;  %p2404_p5 = por %p2403_p9, %p2402_p6 }
  0x55   : > { %p2398_p1 = pneg %p2397_p13 }
  0x57   : > { %p2405_p10 = pnand %p2404_p5, %p2398_p1 }
  0x59   : > { %2408 = shalt.err (!%p2405_p10)
}
  0x5a   : > { %2224 = dma.hbm_to_vmem [thread:$0]  (!%p2616_p12), %s3026_s7, 256, %s344_s22, [#allocation6], %s2484_s24, %s2484_s24, %s2485_s26  }
  0x5b   : > { %p3053_p2 = scmp.ne.s32.totalorder %s3050_s29, 0 }
  0x5c   : > { %p3054_p0 = scmp.eq.s32.totalorder (!%p3053_p2), %s2578_s21, 0 }
  0x5d   : > { %375 = sbr.rel (%p3053_p2) target bundleno = 2461 (0x99d), region = 64 }
  0x64   : > { %2454 = dma.done.wait (%p3054_p0), [#allocation3], 256   ;;  %p3055_p3 = pmov %p3054_p0 }
  0x65   : > { %p3056_p5 = pmov %p3054_p0 }
  0x66   : > { %2456 = vsyncadd (%p3055_p3), [#allocation3], 4294967040 }
  0x67   : > { %2458 = dma.done.wait (%p3056_p5), [#allocation6], 512   ;;  %p3057_p10 = pmov %p3054_p0 }
  0x68   : > { %p422_p4 = scmp.lt.s32.totalorder %s2578_s21, 1  ;;  %vm430_vm0 = vcmask 261120   ;;  %v2283_v3 = vld [vmem:[%s3021_s2] sm:$0xff]   ;;  %v2486_v5 = vmov 0.0   ;;  %v2285_v6 = vld [vmem:[%s3021_s2 + $0x8] sm:$0xff]   ;;  %vm2487_vm1 = vmmov 0   ;;  %v639_v37 = vlaneseq }
  0x69   : > { %2460 = vsyncadd (%p3057_p10), [#allocation6], 4294966784  ;;  %v2284_v4 = vld [vmem:[%s3022_s3] sm:$0xff]   ;;  %2101 = vmatprep.subr.bf16.mxu0 %v2486_v5  ;;  %2109 = vmatprep.subr.bf16.mxu1 %v2486_v5  ;;  %v2286_v7 = vld [vmem:[%s3022_s3 + $0x8] sm:$0xff]   ;;  %s2488_s15 = smov 112   ;;  %s2489_s11 = smov 120  }
  0x6a   : > { %s423_s23 = scalar_select %p422_p4, %s2578_s21, 1  ;;  %2102 = vmatpush3.bf16.msra.mxu0 %v2283_v3  ;;  %2110 = vmatpush3.bf16.msra.mxu1 %v2284_v4  ;;  %v2020_v17 = vld [vmem:[%s3020_s1] ss:$0 sm:$0xff]  ;;  %v2288_v22 = vld [vmem:[#allocation2 + $0x8] sm:$0xff]   ;;  %v2491_v35 = vmov 1983009808  }
  0x6b   : > { %2103 = vmatprep.subr.bf16.mxu0 %v2486_v5  ;;  %2111 = vmatprep.subr.bf16.mxu1 %v2486_v5  ;;  %v2287_v20 = vld [vmem:[#allocation2] sm:$0xff]   ;;  %v637_v36 = vunpack.c.l.s4 %v2491_v35  ;;  %v2492_v38 = vmov 1934713408   ;;  %v2775_v41 = vshrl.u32 %v639_v37, 7  ;;  %vm1074_vm4 = vcmask 64512   ;;  %s2494_s22 = smov 8  }
  0x6c   : > { %s2019_s13 = sshll.u32 %s423_s23, 3  ;;  %2105 = vmatprep.mubr.msk.bf16.mxu0 %vm2487_vm1, %v2486_v5  ;;  %2113 = vmatprep.mubr.msk.bf16.mxu1 %vm2487_vm1, %v2486_v5  ;;  %s2490_s23 = smov 104   ;;  %v669_v39 = vunpack.c.l.s4 %v2492_v38  ;;  %vm1325_vm6 = vcmask 1043456   ;;  %vm1656_vm7 = vcmask 130048   ;;  %vm1658_vm8 = vcmask 195584  }
  0x6d   : > { %s425_s24 = scalar_lea.vmem %s3019_s0, %s2019_s13  ;;  %v638_v40 = vunpack.c.0.s8 %v637_v36  ;;  %s2493_s13 = smov 16   ;;  %vm1858_vm11 = vcmask 523264  }
  0x6e   : > { %v2719_v0 = vld [vmem:[%s425_s24] sm:$0xff]  ;;  %2104 = vmatpush3.bf16.msra.mxu0 %v2285_v6  ;;  %2112 = vmatpush3.bf16.msra.mxu1 %v2286_v7  ;;  %v670_v43 = vunpack.c.0.s8 %v669_v39  ;;  %s2495_s29 = smov 24   ;;  %s3058_s28 = sld [smem:[#allocation18_spill]] }
  0x6f   : > { %v429_v1 = vmul.f32 %v2719_v0, %v2719_v0  ;;  %2117 = vmatprep.subr.bf16.mxu0 %v2486_v5  ;;  %2125 = vmatprep.subr.bf16.mxu1 %v2486_v5  ;;  %v2778_v44 = vsub.s32 %v638_v40, %v2775_v41  ;;  %p3059_p7 = scmp.ne.s32.totalorder %s3047_s27, 0  ;;  %s2496_s14 = smov [#allocation8]  }
  0x70   : > { %v2781_v51 = vsub.s32 %v670_v43, %v2775_v41  ;;  %s2413_s16 = sshll.u32 %s2496_s14, 4  ;;  %s2414_s16 = int_to_ptr.vmem [resolvable:$false] %s2413_s16 }
  0x71   : > { %v431_v2 = vsel %vm430_vm0, %v429_v1, 0.0  ;;  %s2415_s19 = scalar_lea.vmem %s2414_s16, 256 }
  0x72   : > { %432 = vadd.xlane.f32.xlu0 %v431_v2 }
  0xff   : > { %v433_v8 = vpop.xlane.xlu0 %432 }
 0x100   : > { %v434_v9 = vmul.f32 0.03125, %v433_v8 }
 0x102   : > { %2297 = vrsqrt.f32 %v434_v9  ;;  %vm437_vm2 = vcmp.eq.f32.partialorder %v434_v9, inf  ;;  %v440_v12 = vand.u32 2147483648, %v434_v9  ;;  %vm439_vm3 = vcmp.eq.f32.partialorder %v434_v9, 0.0 }
 0x10c   : > { %v2298_v10 = vpop.eup %2297 }
 0x10d   : > { %v436_v11 = vmul.f32 %v2298_v10, %v434_v9 }
 0x10f   : > { %v438_v13 = vsel %vm437_vm2, %v434_v9, %v436_v11 }
 0x110   : > { %v441_v14 = vsel %vm439_vm3, %v440_v12, %v438_v13 }
 0x111   : > { %v442_v15 = vadd.f32 1e-08, %v441_v14 }
 0x113   : > { %2299 = vrcp.f32 %v442_v15 }
 0x11d   : > { %v2300_v16 = vpop.eup %2299 }
 0x11e   : > { %v444_v18 = vmul.f32 %v2300_v16, %v2719_v0 }
 0x120   : > { %v451_v19 = vmul.f32 %v2020_v17, %v444_v18 }
 0x122   : > { %v452_v21 = vpack.c.bf16 %v451_v19, %v451_v19 }
 0x124   : > { %2106 = vmatmul.mubr.msk.bf16.vlgmr.msra.gmra.mrb[0].mxu0 %vm430_vm0, %v452_v21  ;;  %2114 = vmatmul.mubr.msk.bf16.vlgmr.msra.gmra.mrb[0].mxu1 %vm430_vm0, %v452_v21 }
 0x125   : > { %2118 = vmatpush3.bf16.msra.mxu0 %v2287_v20  ;;  %2121 = vmatprep.mubr.msk.bf16.mxu0 %vm2487_vm1, %v2486_v5 }
 0x126   : > { %2119 = vmatprep.subr.bf16.mxu0 %v2486_v5  ;;  %2127 = vmatprep.mubr.msk.bf16.mxu1 %vm2487_vm1, %v2486_v5 }
 0x129   : > { %2120 = vmatpush3.bf16.msra.mxu0 %v2288_v22 }
 0x12a   : > { %2131 = vmatprep.subr.bf16.mxu0 %v2486_v5 }
 0x12c   : > { %2122 = vmatmul.mubr.msk.bf16.vlgmr.msra.gmra.mrb[4].mxu0 %vm430_vm0, %v452_v21 }
 0x12d   : > { %2133 = vmatprep.mubr.msk.bf16.mxu0 %vm2487_vm1, %v2486_v5 }
 0x1f7   : > { %v2761_v23 = vpop.f32.mrb[0].mxu0  ;;  %v562_v24 = vpop.f32.mrb[0].mxu1 }
 0x1f8   : > { %778 = vrot.lane.b32.xlu1 %v562_v24, %s2488_s15  ;;  %775 = vrot.lane.b32.xlu0 %v562_v24, %s2489_s11  ;;  %v2107_v25 = vpop.f32.mrb[1].mxu0  ;;  %v2115_v26 = vpop.f32.mrb[1].mxu1 }
 0x1f9   : > { %v509_v27 = vpop.f32.mrb[2].mxu0  ;;  %v565_v28 = vpop.f32.mrb[2].mxu1 }
 0x1fa   : > { %v2108_v29 = vpop.f32.mrb[3].mxu0  ;;  %v2116_v30 = vpop.f32.mrb[3].mxu1 }
 0x1fc   : > { %781 = vrot.lane.b32.xlu1 %v562_v24, %s2490_s23 }
 0x1ff   : > { %v2766_v31 = vpop.f32.mrb[4].mxu0 }
 0x200   : > { %625 = vrot.lane.b32.xlu1 %v2761_v23, %s2489_s11  ;;  %v2123_v32 = vpop.f32.mrb[5].mxu0 }
 0x201   : > { %v621_v33 = vpop.f32.mrb[6].mxu0 }
 0x202   : > { %v2124_v34 = vpop.f32.mrb[7].mxu0 }
 0x204   : > { %628 = vrot.lane.b32.xlu1 %v2761_v23, %s2488_s15 }
 0x208   : > { %631 = vrot.lane.b32.xlu1 %v2761_v23, %s2490_s23 }
 0x26a   : > { %v779_v42 = vpop.permute.xlu1 %778  ;;  %v776_v47 = vpop.permute.xlu0 %775 }
 0x26b   : > { %v784_v45 = vcombine.low %v562_v24, %v779_v42  ;;  %v785_v46 = vcombine.high %v562_v24, %v779_v42 }
 0x26d   : > { %v792_v52 = vrot.slane %v784_v45, %v2778_v44  ;;  %v799_v53 = vrot.slane %v785_v46, %v2778_v44 }
 0x26e   : > { %v782_v48 = vpop.permute.xlu1 %781 }
 0x26f   : > { %v800_v49 = vcombine.low %v776_v47, %v782_v48  ;;  %v801_v50 = vcombine.high %v776_v47, %v782_v48 }
 0x271   : > { %v808_v54 = vrot.slane %v800_v49, %v2778_v44  ;;  %v815_v55 = vrot.slane %v801_v50, %v2778_v44 }
 0x272   : > { %v626_v56 = vpop.permute.xlu1 %625 }
 0x273   : > { %v816_v57 = vcombine.low %v792_v52, %v808_v54  ;;  %v817_v58 = vcombine.high %v792_v52, %v808_v54  ;;  %v832_v59 = vcombine.low %v799_v53, %v815_v55  ;;  %v833_v60 = vcombine.high %v799_v53, %v815_v55 }
 0x275   : > { %v824_v61 = vrot.slane %v816_v57, %v2781_v51  ;;  %v831_v62 = vrot.slane %v817_v58, %v2781_v51  ;;  %v840_v63 = vrot.slane %v832_v59, %v2781_v51  ;;  %v847_v1 = vrot.slane %v833_v60, %v2781_v51 }
 0x276   : > { %v629_v2 = vpop.permute.xlu1 %628 }
 0x277   : > { %v852_v3 = vcombine.low %v824_v61, %v831_v62  ;;  %v2032_v4 = vcombine.high %v824_v61, %v831_v62  ;;  %v868_v6 = vcombine.low %v840_v63, %v847_v1  ;;  %v2033_v7 = vcombine.high %v840_v63, %v847_v1 }
 0x278   : > { %v634_v8 = vcombine.low %v2761_v23, %v629_v2  ;;  %v635_v9 = vcombine.high %v2761_v23, %v629_v2 }
 0x279   : > { %v859_v10 = vrot.slane %v852_v3, %v2778_v44  ;;  %v867_v11 = vrot.slane %v2032_v4, %v2778_v44  ;;  %v875_v12 = vrot.slane %v868_v6, %v2778_v44  ;;  %v883_v13 = vrot.slane %v2033_v7, %v2778_v44 }
 0x27a   : > { %v632_v14 = vpop.permute.xlu1 %631  ;;  %v642_v19 = vrot.slane %v634_v8, %v2778_v44  ;;  %v649_v20 = vrot.slane %v635_v9, %v2778_v44 }
 0x27b   : > { %v650_v15 = vcombine.low %v626_v56, %v632_v14  ;;  %v651_v16 = vcombine.high %v626_v56, %v632_v14  ;;  %v884_v17 = vcombine.low %v859_v10, %v867_v11  ;;  %v900_v18 = vcombine.low %v875_v12, %v883_v13 }
 0x27c   : > { %v885_v25 = vcombine.high %v859_v10, %v867_v11  ;;  %v901_v26 = vcombine.high %v875_v12, %v883_v13 }
 0x27d   : > { %v658_v21 = vrot.slane %v650_v15, %v2778_v44  ;;  %v665_v22 = vrot.slane %v651_v16, %v2778_v44  ;;  %v892_v23 = vrot.slane %v884_v17, %v2781_v51  ;;  %v908_v24 = vrot.slane %v900_v18, %v2781_v51 }
 0x27e   : > { %v899_v42 = vrot.slane %v885_v25, %v2781_v51  ;;  %v915_v43 = vrot.slane %v901_v26, %v2781_v51  ;;  %v1266_v16 = vand.u32 127, %v639_v37 }
 0x27f   : > { %v666_v27 = vcombine.low %v642_v19, %v658_v21  ;;  %v667_v28 = vcombine.high %v642_v19, %v658_v21  ;;  %v682_v29 = vcombine.low %v649_v20, %v665_v22  ;;  %v683_v30 = vcombine.high %v649_v20, %v665_v22 }
 0x280   : > { %v916_v32 = vcombine.low %v892_v23, %v908_v24  ;;  %v917_v33 = vcombine.high %v892_v23, %v908_v24  ;;  %v918_v58 = vcombine.low %v899_v42, %v915_v43  ;;  %v919_v59 = vcombine.high %v899_v42, %v915_v43 }
 0x281   : > { %v674_v34 = vrot.slane %v666_v27, %v2781_v51  ;;  %v681_v35 = vrot.slane %v667_v28, %v2781_v51  ;;  %v690_v36 = vrot.slane %v682_v29, %v2781_v51  ;;  %v697_v38 = vrot.slane %v683_v30, %v2781_v51 }
 0x282   : > { %v920_v39 = vpack.c.bf16 %v916_v32, %v916_v32  ;;  %v921_v40 = vpack.c.bf16 %v917_v33, %v917_v33  ;;  %v922_v3 = vpack.c.bf16 %v918_v58, %v918_v58  ;;  %v923_v4 = vpack.c.bf16 %v919_v59, %v919_v59 }
 0x283   : > { %v702_v45 = vcombine.low %v674_v34, %v681_v35  ;;  %v2030_v46 = vcombine.high %v674_v34, %v681_v35  ;;  %v718_v47 = vcombine.low %v690_v36, %v697_v38  ;;  %v2031_v48 = vcombine.high %v690_v36, %v697_v38 }
 0x284   : > { %v1079_v49 = vsel %vm1074_vm4, %v920_v39, 0  ;;  %v1125_v50 = vsel %vm1074_vm4, %v921_v40, 0  ;;  %v1171_v10 = vsel %vm1074_vm4, %v922_v3, 0  ;;  %v1217_v11 = vsel %vm1074_vm4, %v923_v4, 0 }
 0x285   : > { %v709_v52 = vrot.slane %v702_v45, %v2778_v44  ;;  %v717_v53 = vrot.slane %v2030_v46, %v2778_v44  ;;  %v725_v54 = vrot.slane %v718_v47, %v2778_v44  ;;  %v733_v55 = vrot.slane %v2031_v48, %v2778_v44  ;;  %2126 = vmatpush3.bf16.xpose.msra.mxu1 %v1079_v49 }
 0x286   : > { %2132 = vmatpush3.bf16.xpose.msra.mxu0 %v1125_v50  ;;  %2137 = vmatprep.subr.bf16.mxu1 %v2486_v5  ;;  %vm1267_vm5 = vcmp.ge.s32.totalorder %v2775_v41, %v1266_v16 }
 0x287   : > { %v734_v56 = vcombine.low %v709_v52, %v717_v53  ;;  %v750_v57 = vcombine.low %v725_v54, %v733_v55  ;;  %2143 = vmatprep.subr.bf16.mxu0 %v2486_v5  ;;  %v735_v60 = vcombine.high %v709_v52, %v717_v53  ;;  %v751_v61 = vcombine.high %v725_v54, %v733_v55 }
 0x289   : > { %v742_v62 = vrot.slane %v734_v56, %v2781_v51  ;;  %v758_v63 = vrot.slane %v750_v57, %v2781_v51  ;;  %v749_v8 = vrot.slane %v735_v60, %v2781_v51  ;;  %v765_v9 = vrot.slane %v751_v61, %v2781_v51 }
 0x28b   : > { %v766_v1 = vcombine.low %v742_v62, %v758_v63  ;;  %v767_v2 = vcombine.high %v742_v62, %v758_v63  ;;  %v768_v12 = vcombine.low %v749_v8, %v765_v9  ;;  %v769_v13 = vcombine.high %v749_v8, %v765_v9 }
 0x28d   : > { %v770_v6 = vpack.c.bf16 %v766_v1, %v766_v1  ;;  %v771_v7 = vpack.c.bf16 %v767_v2, %v767_v2  ;;  %v772_v14 = vpack.c.bf16 %v768_v12, %v768_v12  ;;  %v773_v15 = vpack.c.bf16 %v769_v13, %v769_v13 }
 0x28f   : > { %2128 = vmatmul.mubr.msk.bf16.vlgmr.msra.gmra.mrb[4].mxu1 %vm1074_vm4, %v770_v6  ;;  %2134 = vmatmul.mubr.msk.bf16.vlgmr.msra.gmra.mrb[8].mxu0 %vm1074_vm4, %v771_v7 }
 0x290   : > { %2138 = vmatpush3.bf16.xpose.msra.mxu1 %v1171_v10  ;;  %2144 = vmatpush3.bf16.xpose.msra.mxu0 %v1217_v11 }
 0x291   : > { %2139 = vmatprep.mubr.msk.bf16.mxu1 %vm2487_vm1, %v2486_v5  ;;  %2145 = vmatprep.mubr.msk.bf16.mxu0 %vm2487_vm1, %v2486_v5 }
 0x292   : > { %2149 = vmatprep.subr.bf16.mxu1 %v2486_v5  ;;  %2155 = vmatprep.subr.bf16.mxu0 %v2486_v5 }
 0x297   : > { %2140 = vmatmul.mubr.msk.bf16.vlgmr.msra.gmra.mrb[8].mxu1 %vm1074_vm4, %v772_v14  ;;  %2146 = vmatmul.mubr.msk.bf16.vlgmr.msra.gmra.mrb[12].mxu0 %vm1074_vm4, %v773_v15 }
 0x298   : > { %2151 = vmatprep.mubr.msk.bf16.mxu1 %vm2487_vm1, %v2486_v5  ;;  %2157 = vmatprep.mubr.msk.bf16.mxu0 %vm2487_vm1, %v2486_v5 }
 0x362   : > { %v1115_v17 = vpop.f32.mrb[4].mxu1  ;;  %v1161_v18 = vpop.f32.mrb[8].mxu0 }
 0x363   : > { %v1259_v19 = vmul.f32 0.35355338, %v1115_v17  ;;  %v1260_v20 = vmul.f32 0.35355338, %v1161_v18  ;;  %v2129_v21 = vpop.f32.mrb[5].mxu1  ;;  %v2135_v22 = vpop.f32.mrb[9].mxu0 }
 0x364   : > { %v1118_v23 = vpop.f32.mrb[6].mxu1  ;;  %v1164_v24 = vpop.f32.mrb[10].mxu0 }
 0x365   : > { %v2130_v25 = vpop.f32.mrb[7].mxu1  ;;  %v2136_v26 = vpop.f32.mrb[11].mxu0  ;;  %v1270_v27 = vsel %vm1267_vm5, %v1259_v19, -1e+09  ;;  %v1271_v28 = vsel %vm1267_vm5, %v1260_v20, -1e+09 }
 0x366   : > { %v1274_v37 = vsel %vm1074_vm4, %v1270_v27, -inf  ;;  %v1277_v29 = vsel %vm1074_vm4, %v1271_v28, -inf }
 0x367   : > { %1275 = vmax.xlane.f32.xlu1 %v1274_v37  ;;  %1278 = vmax.xlane.f32.xlu0 %v1277_v29 }
 0x36a   : > { %v1207_v30 = vpop.f32.mrb[8].mxu1  ;;  %v1253_v32 = vpop.f32.mrb[12].mxu0 }
 0x36b   : > { %v1261_v33 = vmul.f32 0.35355338, %v1207_v30  ;;  %v1262_v34 = vmul.f32 0.35355338, %v1253_v32  ;;  %v2141_v35 = vpop.f32.mrb[9].mxu1  ;;  %v2147_v36 = vpop.f32.mrb[13].mxu0 }
 0x36c   : > { %v1210_v38 = vpop.f32.mrb[10].mxu1  ;;  %v1256_v39 = vpop.f32.mrb[14].mxu0 }
 0x36d   : > { %v2142_v40 = vpop.f32.mrb[11].mxu1  ;;  %v2148_v42 = vpop.f32.mrb[15].mxu0  ;;  %v1272_v43 = vsel %vm1267_vm5, %v1261_v33, -1e+09  ;;  %v1273_v45 = vsel %vm1267_vm5, %v1262_v34, -1e+09 }
 0x36e   : > { %v1280_v46 = vsel %vm1074_vm4, %v1272_v43, -inf  ;;  %v1283_v47 = vsel %vm1074_vm4, %v1273_v45, -inf }
 0x36f   : > { %1281 = vmax.xlane.f32.xlu1 %v1280_v46  ;;  %1284 = vmax.xlane.f32.xlu0 %v1283_v47 }
 0x380   : > { %925 = vrot.lane.b32.xlu1 %v2766_v31, %s2489_s11  ;;  %s419_s11 = sand.u32 1, %s2471_s18  }
 0x3f4   : > { %v1276_v48 = vpop.xlane.xlu1 %1275  ;;  %v1279_v49 = vpop.xlane.xlu0 %1278 }
 0x3f5   : > { %v1286_v50 = vsub.f32 %v1270_v27, %v1276_v48  ;;  %v1287_v52 = vsub.f32 %v1271_v28, %v1279_v49 }
 0x3f7   : > { %v1290_v53 = vmul.f32 1.442695, %v1286_v50  ;;  %v1292_v54 = vmul.f32 1.442695, %v1287_v52 }
 0x3f9   : > { %2301 = vpow2.f32 %v1290_v53 }
 0x3fa   : > { %2303 = vpow2.f32 %v1292_v54 }
 0x3fc   : > { %v1282_v58 = vpop.xlane.xlu1 %1281  ;;  %v1285_v59 = vpop.xlane.xlu0 %1284 }
 0x3fd   : > { %v1288_v60 = vsub.f32 %v1272_v43, %v1282_v58  ;;  %v1289_v61 = vsub.f32 %v1273_v45, %v1285_v59 }
 0x3ff   : > { %v1294_v62 = vmul.f32 1.442695, %v1288_v60  ;;  %v1296_v63 = vmul.f32 1.442695, %v1289_v61 }
 0x400   : > { %v926_v6 = vpop.permute.xlu1 %925 }
 0x401   : > { %2305 = vpow2.f32 %v1294_v62 }
 0x402   : > { %2307 = vpow2.f32 %v1296_v63 }
 0x403   : > { %v2853_v55 = vpop.eup %2301 }
 0x404   : > { %v2855_v41 = vpop.eup %2303  ;;  %v1298_v56 = vsel %vm1074_vm4, %v2853_v55, 0.0 }
 0x405   : > { %1299 = vadd.xlane.f32.xlu1 %v1298_v56  ;;  %v1301_v57 = vsel %vm1074_vm4, %v2855_v41, 0.0 }
 0x406   : > { %1302 = vadd.xlane.f32.xlu0 %v1301_v57 }
 0x40b   : > { %v2865_v1 = vpop.eup %2305 }
 0x40c   : > { %v2867_v2 = vpop.eup %2307  ;;  %v1304_v3 = vsel %vm1074_vm4, %v2865_v1, 0.0 }
 0x40d   : > { %v1307_v4 = vsel %vm1074_vm4, %v2867_v2, 0.0 }
 0x416   : > { %931 = vrot.lane.b32.xlu1 %v2766_v31, %s2490_s23  ;;  %s2018_s23 = sshll.u32 %s419_s11, 3 }
 0x417   : > { %s421_s24 = scalar_lea.vmem [#allocation8], %s2018_s23 }
 0x418   : > { %s1918_s26 = sshll.u32 %s421_s24, 4  ;;  %s2978_s26 = int_to_ptr.vmem [resolvable:$true] %s1918_s26 }
 0x419   : > { %s2409_s30 = scalar_lea.vmem %s2978_s26, 128  ;;  %p2416_p13 = scmp.lt.s32.totalorder %s2978_s26, %s2414_s16 }
 0x41a   : > { %p2410_p12 = scmp.ne.s32.totalorder %s2978_s26, %s2409_s30  ;;  %p2417_p1 = scmp.lt.s32.totalorder %s2415_s19, %s2409_s30 }
 0x41c   : > { %928 = vrot.lane.b32.xlu0 %v2766_v31, %s2488_s15  ;;  %p2411_p8 = pnand %p2410_p12, %p3059_p7  ;;  %p2418_p6 = por %p2417_p1, %p2416_p13 }
 0x41e   : > { %p2412_p11 = pneg %p2411_p8 }
 0x420   : > { %p2419_p9 = pnand %p2418_p6, %p2412_p11 }
 0x43a   : > { %1305 = vadd.xlane.f32.xlu1 %v1304_v3 }
 0x43b   : > { %1308 = vadd.xlane.f32.xlu0 %v1307_v4 }
 0x492   : > { %v1300_v7 = vpop.xlane.xlu1 %1299 }
 0x493   : > { %v1303_v8 = vpop.xlane.xlu0 %1302  ;;  %2309 = vrcp.f32 %v1300_v7 }
 0x494   : > { %2311 = vrcp.f32 %v1303_v8 }
 0x496   : > { %v932_v9 = vpop.permute.xlu1 %931 }
 0x497   : > { %v950_v10 = vcombine.low %v926_v6, %v932_v9  ;;  %v951_v11 = vcombine.high %v926_v6, %v932_v9  ;;  %v929_v12 = vpop.permute.xlu0 %928 }
 0x498   : > { %v934_v13 = vcombine.low %v2766_v31, %v929_v12  ;;  %v935_v14 = vcombine.high %v2766_v31, %v929_v12 }
 0x499   : > { %v958_v15 = vrot.slane %v950_v10, %v2778_v44  ;;  %v965_v16 = vrot.slane %v951_v11, %v2778_v44  ;;  %v2289_v11 = vld [vmem:[#allocation5] sm:$0xff]  }
 0x49a   : > { %v942_v17 = vrot.slane %v934_v13, %v2778_v44  ;;  %v949_v18 = vrot.slane %v935_v14, %v2778_v44 }
 0x49c   : > { %v966_v19 = vcombine.low %v942_v17, %v958_v15  ;;  %v967_v20 = vcombine.high %v942_v17, %v958_v15  ;;  %v982_v21 = vcombine.low %v949_v18, %v965_v16  ;;  %v983_v22 = vcombine.high %v949_v18, %v965_v16 }
 0x49d   : > { %v2310_v42 = vpop.eup %2309 }
 0x49e   : > { %v974_v23 = vrot.slane %v966_v19, %v2781_v51  ;;  %v981_v24 = vrot.slane %v967_v20, %v2781_v51  ;;  %v990_v31 = vrot.slane %v982_v21, %v2781_v51  ;;  %v997_v25 = vrot.slane %v983_v22, %v2781_v51  ;;  %v2312_v46 = vpop.eup %2311 }
 0x49f   : > { %v1314_v52 = vmul.f32 %v2310_v42, %v2853_v55  ;;  %v1315_v53 = vmul.f32 %v2312_v46, %v2855_v41 }
 0x4a0   : > { %v1002_v26 = vcombine.low %v974_v23, %v981_v24  ;;  %v2034_v27 = vcombine.high %v974_v23, %v981_v24  ;;  %v1018_v28 = vcombine.low %v990_v31, %v997_v25  ;;  %v2035_v37 = vcombine.high %v990_v31, %v997_v25 }
 0x4a1   : > { %v1318_v61 = vpack.c.bf16 %v1314_v52, %v1314_v52  ;;  %v1319_v62 = vpack.c.bf16 %v1315_v53, %v1315_v53 }
 0x4a2   : > { %v1009_v29 = vrot.slane %v1002_v26, %v2778_v44  ;;  %v1017_v30 = vrot.slane %v2034_v27, %v2778_v44  ;;  %v1025_v32 = vrot.slane %v1018_v28, %v2778_v44  ;;  %v1033_v33 = vrot.slane %v2035_v37, %v2778_v44 }
 0x4a4   : > { %v1034_v34 = vcombine.low %v1009_v29, %v1017_v30  ;;  %v1035_v35 = vcombine.high %v1009_v29, %v1017_v30  ;;  %v1050_v36 = vcombine.low %v1025_v32, %v1033_v33  ;;  %v1051_v38 = vcombine.high %v1025_v32, %v1033_v33 }
 0x4a6   : > { %v1042_v39 = vrot.slane %v1034_v34, %v2781_v51  ;;  %v1049_v40 = vrot.slane %v1035_v35, %v2781_v51  ;;  %v1058_v43 = vrot.slane %v1050_v36, %v2781_v51  ;;  %v1065_v45 = vrot.slane %v1051_v38, %v2781_v51  ;;  %v2290_v38 = vld [vmem:[#allocation5 + $0x8] sm:$0xff]  }
 0x4a8   : > { %v1066_v47 = vcombine.low %v1042_v39, %v1058_v43  ;;  %v1067_v48 = vcombine.high %v1042_v39, %v1058_v43  ;;  %v1068_v49 = vcombine.low %v1049_v40, %v1065_v45  ;;  %v1069_v50 = vcombine.high %v1049_v40, %v1065_v45 }
 0x4aa   : > { %v1070_v54 = vpack.c.bf16 %v1066_v47, %v1066_v47  ;;  %v1071_v56 = vpack.c.bf16 %v1067_v48, %v1067_v48  ;;  %v1072_v59 = vpack.c.bf16 %v1068_v49, %v1068_v49  ;;  %v1073_v60 = vpack.c.bf16 %v1069_v50, %v1069_v50 }
 0x4ac   : > { %v1327_v57 = vsel %vm1325_vm6, %v1070_v54, 0  ;;  %v1373_v58 = vsel %vm1325_vm6, %v1071_v56, 0  ;;  %v1419_v55 = vsel %vm1325_vm6, %v1072_v59, 0  ;;  %v1465_v41 = vsel %vm1325_vm6, %v1073_v60, 0 }
 0x4ad   : > { %2150 = vmatpush3.bf16.msra.mxu1 %v1327_v57  ;;  %2156 = vmatpush3.bf16.msra.mxu0 %v1373_v58 }
 0x4ae   : > { %2161 = vmatprep.subr.bf16.mxu1 %v2486_v5  ;;  %2167 = vmatprep.subr.bf16.mxu0 %v2486_v5 }
 0x4b0   : > { %2152 = vmatmul.mubr.msk.bf16.vlgmr.msra.gmra.mrb[12].mxu1 %vm1074_vm4, %v1318_v61  ;;  %2158 = vmatmul.mubr.msk.bf16.vlgmr.msra.gmra.mrb[16].mxu0 %vm1074_vm4, %v1319_v62 }
 0x4b1   : > { %2162 = vmatpush3.bf16.msra.mxu1 %v1419_v55  ;;  %2168 = vmatpush3.bf16.msra.mxu0 %v1465_v41 }
 0x4b2   : > { %2163 = vmatprep.mubr.msk.bf16.mxu1 %vm2487_vm1, %v2486_v5  ;;  %2169 = vmatprep.mubr.msk.bf16.mxu0 %vm2487_vm1, %v2486_v5 }
 0x4b3   : > { %2173 = vmatprep.subr.bf16.mxu1 %v2486_v5  ;;  %2181 = vmatprep.subr.bf16.mxu0 %v2486_v5 }
 0x4c7   : > { %v1306_v63 = vpop.xlane.xlu1 %1305 }
 0x4c8   : > { %2313 = vrcp.f32 %v1306_v63  ;;  %v1309_v3 = vpop.xlane.xlu0 %1308 }
 0x4c9   : > { %2315 = vrcp.f32 %v1309_v3 }
 0x4d2   : > { %v2314_v4 = vpop.eup %2313 }
 0x4d3   : > { %v2316_v6 = vpop.eup %2315  ;;  %v1316_v7 = vmul.f32 %v2314_v4, %v2865_v1 }
 0x4d4   : > { %v1317_v8 = vmul.f32 %v2316_v6, %v2867_v2 }
 0x4d5   : > { %v1320_v9 = vpack.c.bf16 %v1316_v7, %v1316_v7 }
 0x4d6   : > { %v1321_v10 = vpack.c.bf16 %v1317_v8, %v1317_v8 }
 0x4d7   : > { %2164 = vmatmul.mubr.msk.bf16.vlgmr.msra.gmra.mrb[16].mxu1 %vm1074_vm4, %v1320_v9 }
 0x4d8   : > { %2170 = vmatmul.mubr.msk.bf16.vlgmr.msra.gmra.mrb[20].mxu0 %vm1074_vm4, %v1321_v10  ;;  %2177 = vmatprep.mubr.msk.bf16.mxu1 %vm2487_vm1, %v2486_v5 }
 0x4d9   : > { %2185 = vmatprep.mubr.msk.bf16.mxu0 %vm2487_vm1, %v2486_v5  ;;  %2174 = vmatpush3.bf16.msra.mxu1 %v2289_v11 }
 0x4da   : > { %2175 = vmatprep.subr.bf16.mxu1 %v2486_v5 }
 0x4dd   : > { %2176 = vmatpush3.bf16.msra.mxu1 %v2290_v38 }
 0x4de   : > { %2189 = vmatprep.subr.bf16.mxu1 %v2486_v5 }
 0x583   : > { %v1363_v12 = vpop.f32.mrb[12].mxu1  ;;  %v1409_v1 = vpop.f32.mrb[16].mxu0 }
 0x584   : > { %v2153_v13 = vpop.f32.mrb[13].mxu1  ;;  %v2159_v2 = vpop.f32.mrb[17].mxu0 }
 0x585   : > { %v1366_v14 = vpop.f32.mrb[14].mxu1  ;;  %v1412_v15 = vpop.f32.mrb[18].mxu0 }
 0x586   : > { %v2154_v16 = vpop.f32.mrb[15].mxu1  ;;  %v2160_v17 = vpop.f32.mrb[19].mxu0  ;;  %v2291_v15 = vld [vmem:[#allocation7] sm:$0xff]  }
 0x587   : > { %2182 = vmatpush3.bf16.msra.mxu0 %v2291_v15  ;;  %v2292_v16 = vld [vmem:[#allocation7 + $0x8] sm:$0xff]  }
 0x588   : > { %2183 = vmatprep.subr.bf16.mxu0 %v2486_v5 }
 0x58b   : > { %2184 = vmatpush3.bf16.msra.mxu0 %v2292_v16 }
 0x5aa   : > { %v1455_v18 = vpop.f32.mrb[16].mxu1 }
 0x5ab   : > { %v1507_v19 = vcombine.low %v1363_v12, %v1455_v18  ;;  %v1508_v20 = vcombine.high %v1363_v12, %v1455_v18  ;;  %v1501_v21 = vpop.f32.mrb[20].mxu0  ;;  %v2165_v22 = vpop.f32.mrb[17].mxu1 }
 0x5ac   : > { %v1523_v23 = vcombine.low %v1409_v1, %v1501_v21  ;;  %v1524_v24 = vcombine.high %v1409_v1, %v1501_v21  ;;  %v2171_v31 = vpop.f32.mrb[21].mxu0  ;;  %v1458_v25 = vpop.f32.mrb[18].mxu1 }
 0x5ad   : > { %v1515_v26 = vrot.slane %v1507_v19, %v2778_v44  ;;  %v1522_v27 = vrot.slane %v1508_v20, %v2778_v44  ;;  %v1504_v28 = vpop.f32.mrb[22].mxu0  ;;  %v2166_v37 = vpop.f32.mrb[19].mxu1  ;;  %v2049_v31 = vld [vmem:[%s3025_s6] ss:$0 sm:$0xff] }
 0x5ae   : > { %v1531_v29 = vrot.slane %v1523_v23, %v2778_v44  ;;  %v1538_v30 = vrot.slane %v1524_v24, %v2778_v44  ;;  %v2172_v32 = vpop.f32.mrb[23].mxu0  ;;  %v2293_v28 = vld [vmem:[%s3028_s9] sm:$0xff]   ;;  %v2294_v37 = vld [vmem:[%s3028_s9 + $0x8] sm:$0xff]  }
 0x5af   : > { %v2050_v32 = vld [vmem:[%s3027_s8] ss:$0 sm:$0xff] }
 0x5b0   : > { %v1539_v33 = vcombine.low %v1515_v26, %v1531_v29  ;;  %v1540_v34 = vcombine.high %v1515_v26, %v1531_v29  ;;  %v1555_v35 = vcombine.low %v1522_v27, %v1538_v30  ;;  %v1556_v36 = vcombine.high %v1522_v27, %v1538_v30  ;;  %v2295_v29 = vld [vmem:[%s3028_s9 + $0x10] sm:$0xff]   ;;  %v2296_v30 = vld [vmem:[%s3028_s9 + $0x18] sm:$0xff]  }
 0x5b2   : > { %v1547_v39 = vrot.slane %v1539_v33, %v2781_v51  ;;  %v1554_v40 = vrot.slane %v1540_v34, %v2781_v51  ;;  %v1563_v42 = vrot.slane %v1555_v35, %v2781_v51  ;;  %v1570_v43 = vrot.slane %v1556_v36, %v2781_v51 }
 0x5b4   : > { %v1575_v45 = vcombine.low %v1547_v39, %v1554_v40  ;;  %v2044_v46 = vcombine.high %v1547_v39, %v1554_v40  ;;  %v1591_v47 = vcombine.low %v1563_v42, %v1570_v43  ;;  %v2045_v48 = vcombine.high %v1563_v42, %v1570_v43 }
 0x5b6   : > { %v1582_v49 = vrot.slane %v1575_v45, %v2778_v44  ;;  %v1590_v50 = vrot.slane %v2044_v46, %v2778_v44  ;;  %v1598_v52 = vrot.slane %v1591_v47, %v2778_v44  ;;  %v1606_v53 = vrot.slane %v2045_v48, %v2778_v44  ;;  %v2055_v46 = vld [vmem:[%s3029_s10] ss:$0 sm:$0xff] }
 0x5b8   : > { %v1608_v54 = vcombine.high %v1582_v49, %v1590_v50  ;;  %v1624_v56 = vcombine.high %v1598_v52, %v1606_v53  ;;  %v1607_v57 = vcombine.low %v1582_v49, %v1590_v50  ;;  %v1623_v58 = vcombine.low %v1598_v52, %v1606_v53 }
 0x5ba   : > { %v1622_v59 = vrot.slane %v1608_v54, %v2781_v51  ;;  %v1638_v60 = vrot.slane %v1624_v56, %v2781_v51  ;;  %v1615_v61 = vrot.slane %v1607_v57, %v2781_v51  ;;  %v1631_v62 = vrot.slane %v1623_v58, %v2781_v51 }
 0x5bc   : > { %v1641_v55 = vcombine.low %v1622_v59, %v1638_v60  ;;  %v1640_v41 = vcombine.high %v1615_v61, %v1631_v62  ;;  %v1642_v63 = vcombine.high %v1622_v59, %v1638_v60  ;;  %v1639_v3 = vcombine.low %v1615_v61, %v1631_v62 }
 0x5be   : > { %1648 = vrot.lane.b32.xlu1 %v1641_v55, %s2493_s13  ;;  %1644 = vrot.lane.b32.xlu0 %v1640_v41, %s2494_s22 }
 0x5c2   : > { %1652 = vrot.lane.b32.xlu1 %v1642_v63, %s2495_s29  ;;  %s2062_s29 = sshll.u32 %s2578_s21, 7  ;;  %s1905_s21 = scalar_lea.sflag [#allocation4], %s419_s11 }
 0x5c3   : > { %s2976_s25 = scalar_lea.hbm %s3058_s28, %s2062_s29 }
 0x630   : > { %v1649_v44 = vpop.permute.xlu1 %1648  ;;  %v1645_v4 = vpop.permute.xlu0 %1644 }
 0x631   : > { %v1655_v6 = vsel %vm1074_vm4, %v1639_v3, %v1645_v4 }
 0x632   : > { %v1657_v8 = vsel %vm1656_vm7, %v1655_v6, %v1649_v44 }
 0x634   : > { %v1653_v7 = vpop.permute.xlu1 %1652 }
 0x635   : > { %v1659_v9 = vsel %vm1658_vm8, %v1657_v8, %v1653_v7 }
 0x636   : > { %v1660_v51 = vpack.c.bf16 %v1659_v9, %v1659_v9 }
 0x638   : > { %2178 = vmatmul.mubr.msk.bf16.vlgmr.msra.gmra.mrb[20].mxu1 %vm430_vm0, %v1660_v51 }
 0x639   : > { %2197 = vmatprep.mubr.msk.bf16.mxu1 %vm2487_vm1, %v2486_v5  ;;  %2190 = vmatpush3.bf16.msra.mxu1 %v2293_v28 }
 0x63a   : > { %2191 = vmatprep.subr.bf16.mxu1 %v2486_v5 }
 0x63d   : > { %2192 = vmatpush3.bf16.msra.mxu1 %v2294_v37 }
 0x63e   : > { %2193 = vmatprep.subr.bf16.mxu1 %v2486_v5 }
 0x641   : > { %2194 = vmatpush3.bf16.msra.mxu1 %v2295_v29 }
 0x642   : > { %2195 = vmatprep.subr.bf16.mxu1 %v2486_v5 }
 0x645   : > { %2196 = vmatpush3.bf16.msra.mxu1 %v2296_v30 }
 0x70b   : > { %v1714_v10 = vpop.f32.mrb[20].mxu1 }
 0x70c   : > { %v2938_v11 = vadd.f32 %v1714_v10, %v2719_v0  ;;  %v2179_v12 = vpop.f32.mrb[21].mxu1 }
 0x70d   : > { %v1717_v1 = vpop.f32.mrb[22].mxu1 }
 0x70e   : > { %v2180_v13 = vpop.f32.mrb[23].mxu1  ;;  %v1722_v2 = vmul.f32 %v2938_v11, %v2938_v11 }
 0x710   : > { %v1723_v14 = vsel %vm430_vm0, %v1722_v2, 0.0 }
 0x711   : > { %1724 = vadd.xlane.f32.xlu0 %v1723_v14 }
 0x79e   : > { %v1725_v17 = vpop.xlane.xlu0 %1724 }
 0x79f   : > { %v1726_v18 = vmul.f32 0.03125, %v1725_v17 }
 0x7a1   : > { %2317 = vrsqrt.f32 %v1726_v18  ;;  %vm1729_vm9 = vcmp.eq.f32.partialorder %v1726_v18, inf  ;;  %v1732_v20 = vand.u32 2147483648, %v1726_v18  ;;  %vm1731_vm10 = vcmp.eq.f32.partialorder %v1726_v18, 0.0 }
 0x7ab   : > { %v2318_v0 = vpop.eup %2317 }
 0x7ac   : > { %v1728_v19 = vmul.f32 %v2318_v0, %v1726_v18 }
 0x7ae   : > { %v1730_v21 = vsel %vm1729_vm9, %v1726_v18, %v1728_v19 }
 0x7af   : > { %v1733_v22 = vsel %vm1731_vm10, %v1732_v20, %v1730_v21 }
 0x7b0   : > { %v1734_v23 = vadd.f32 1e-08, %v1733_v22 }
 0x7b2   : > { %2319 = vrcp.f32 %v1734_v23 }
 0x7bc   : > { %v2320_v24 = vpop.eup %2319 }
 0x7bd   : > { %v1736_v25 = vmul.f32 %v2320_v24, %v2938_v11 }
 0x7bf   : > { %v1743_v26 = vmul.f32 %v2049_v31, %v1736_v25 }
 0x7c1   : > { %v1744_v27 = vpack.c.bf16 %v1743_v26, %v1743_v26 }
 0x7c3   : > { %2186 = vmatmul.mubr.msk.bf16.vlgmr.msra.gmra.mrb[24].mxu0 %vm430_vm0, %v1744_v27 }
 0x896   : > { %v1805_v33 = vpop.f32.mrb[24].mxu0 }
 0x897   : > { %v1806_v34 = vadd.f32 %v2050_v32, %v1805_v33  ;;  %v2187_v35 = vpop.f32.mrb[25].mxu0 }
 0x898   : > { %v1808_v36 = vpop.f32.mrb[26].mxu0 }
 0x899   : > { %v2054_v38 = vmul.f32 -1.442695, %v1806_v34  ;;  %v2188_v39 = vpop.f32.mrb[27].mxu0 }
 0x89b   : > { %2321 = vpow2.f32 %v2054_v38 }
 0x8a5   : > { %v2322_v40 = vpop.eup %2321 }
 0x8a6   : > { %v1814_v5 = vadd.f32 1.0, %v2322_v40 }
 0x8a8   : > { %2323 = vrcp.f32 %v1814_v5 }
 0x8b2   : > { %v2324_v42 = vpop.eup %2323 }
 0x8b3   : > { %v1817_v43 = vmul.f32 %v2324_v42, %v1806_v34 }
 0x8b5   : > { %v1818_v45 = vpack.c.bf16 %v1817_v43, %v1817_v43 }
 0x8b7   : > { %2198 = vmatmul.mubr.msk.bf16.vlgmr.msra.gmra.mrb[24].mxu1 %vm1858_vm11, %v1818_v45 }
 0x98a   : > { %v1896_v47 = vpop.f32.mrb[24].mxu1 }
 0x98b   : > { %v1897_v48 = vadd.f32 %v2055_v46, %v1896_v47  ;;  %v2199_v49 = vpop.f32.mrb[25].mxu1 }
 0x98c   : > { %v1899_v50 = vpop.f32.mrb[26].mxu1 }
 0x98d   : > { %v1902_v52 = vadd.f32 %v1897_v48, %v2938_v11  ;;  %v2200_v53 = vpop.f32.mrb[27].mxu1 }
 0x98f   : > { %1903 = vst.msk [vmem:[%s421_s24] sm:$0xff] %vm430_vm0, %v1902_v52 }
 0x990   : > { %2422 = shalt.err (!%p2419_p9)
}
 0x991   : > { %s2423_s12 = scalar_lea.hbm %s2976_s25, 128  ;;  %s2427_s23 = scalar_lea.hbm %s3058_s28, 256 }
 0x992   : > { %p2424_p2 = scmp.ne.s32.totalorder %s2976_s25, %s2423_s12  ;;  %p2428_p5 = scmp.lt.u32.totalorder %s2976_s25, %s3058_s28 }
 0x993   : > { %p2429_p10 = scmp.lt.u32.totalorder %s2427_s23, %s2423_s12  ;;  %p2431_p12 = scmp.lt.u32.totalorder %s2423_s12, %s2976_s25 }
 0x994   : > { %p2425_p0 = pnand %p2424_p2, %p3059_p7 }
 0x995   : > { %p2430_p4 = por %p2429_p10, %p2428_p5 }
 0x996   : > { %p2426_p3 = pneg %p2425_p0 }
 0x997   : > { %p2432_p8 = por %p2431_p12, %p2430_p4 }
 0x999   : > { %p2433_p11 = pnand %p2432_p8, %p2426_p3 }
 0x99b   : > { %2436 = shalt.err (!%p2433_p11)
}
 0x99c   : > { %2213 = dma.vmem_to_hbm [thread:$0]  (%p3059_p7), %s2978_s26, 128, %s2976_s25, %s1905_s21  }
 0x99d PF: > { %s3060_s29 = sld [smem:[#allocation14_spill]]  ;;  %s3061_s24 = sld [smem:[#allocation12_spill]] }
 0x99e   : > { %s3062_s17 = sld [smem:[#allocation17_spill]] }
 0x9a3   : > { %p2235_p13 = scmp.ge.s32.totalorder %s3060_s29, 2  ;;  %s1930_s20 = sand.u32 1, %s3061_s24  }
 0x9a4   : > { %p3063_p1 = scmp.ne.s32.totalorder %s3062_s17, 0  ;;  %s1931_s30 = scalar_lea.sflag [#allocation4], %s1930_s20 }
 0x9a6   : > { %p2226_p6 = pnand %p2235_p13, %p3063_p1 }
 0x9a8   : > { %2462 = dma.done.wait (!%p2226_p6), %s1931_s30, 128  }
 0x9a9   : > { %2464 = vsyncadd (!%p2226_p6), %s1931_s30, 4294967168  ;;  %s3064_s20 = sld [smem:[#allocation15_spill]]  ;;  %s3065_s14 = sld [smem:[#allocation13_spill]] }
 0x9aa   : > { %s3066_s19 = sld [smem:[#allocation16_spill]]  ;;  %s3067_s17 = smov %s2471_s18 }
 0x9af   : > { %p23_p9 = scmp.ge.s32.totalorder %s3064_s20, 4   ;;  %s3068_s18 = smov %s3065_s14 }
 0x9b1   :  { %25 = sbr.rel (!%p23_p9) target bundleno = 7 (0x7), region = 112 }
 0x9b8   :  { %1936 = vsyncpa [#allocation3], 1 }
 0x9b9   :  { %1938 = vsyncpa [#allocation3 + $0x1], 1 }
 0x9ba   :  { %1939 = vsyncpa [#allocation6], 1 }
 0x9bb   :  { %1940 = vsyncpa [#allocation4], 1 }
 0x9bc   :  { %1942 = vsyncpa [#allocation4 + $0x1], 1 }

</bundles_post_ra>
